<compile_context>
chip_gen: v5e
topology: v5e:2x2
jax: 0.10.0
libtpu: 0.0.40
codegen_flags: <defaults>
</compile_context>

<pallas_src>
import jax
import jax.numpy as jnp
import numpy as np
from jax.experimental import pallas as pl
from jax.experimental.pallas import tpu as pltpu

BN_EPS = 1e-5
LANE = 128
# bf16 operands into the MXU (f32 accumulation). Set to jnp.float32 to recover
# exact PyTorch-f32 numerics for the first two layers.
MATMUL_DTYPE = jnp.bfloat16


def _round_up(n, m):
    return ((n + m - 1) // m) * m


def _bn_relu(h, g, be, inv_n):
    """Training-mode BatchNorm1d (batch statistics, biased variance) + ReLU, f32.
    One-pass stats (var = E[h^2] - mean^2, clamped >= 0); affine folded into a
    single FMA: h*scale + shift."""
    s1 = jnp.sum(h, axis=0, keepdims=True)
    s2 = jnp.sum(h * h, axis=0, keepdims=True)
    mean = s1 * inv_n
    var = jnp.maximum(s2 * inv_n - mean * mean, 0.0)
    scale = jax.lax.rsqrt(var + BN_EPS) * g          # [1, H] row, computed once
    shift = be - mean * scale
    return jnp.maximum(h * scale + shift, 0.0)


def _grad_disc_kernel(x_ref, w1_ref, w2_ref, vecs_ref, out_ref):
    # Batch dim is NOT padded -> batch statistics are over the true batch size.
    inv_n = 1.0 / x_ref.shape[0]

    # Packed per-feature rows: one input DMA instead of six tiny ones.
    g1, be1 = vecs_ref[0:1, :], vecs_ref[1:2, :]
    g2, be2 = vecs_ref[2:3, :], vecs_ref[3:4, :]
    w3_row = vecs_ref[4:5, :]
    b3_row = vecs_ref[5:6, :]                # b3 broadcast across lanes

    # GRL (x * 1.0 + backward hook) is a forward identity -> no op emitted.
    # x cast to the MXU operand dtype inside the kernel; K = in_feature (< 128
    # is fine for the MXU), so no pre-kernel pad/cast dispatch is needed.
    x = x_ref[...].astype(MATMUL_DTYPE)

    # ad_layer1 + batch_norm_1 + relu1. Linear bias dropped: a per-feature
    # constant cancels exactly through batch-stats BatchNorm.
    h = jnp.dot(x, w1_ref[...], preferred_element_type=jnp.float32)
    h = _bn_relu(h, g1, be1, inv_n)
    # dropout1 (p=0.5) omitted — identity in eval / deterministic mode.

    # ad_layer2 + batch_norm_2 + relu2 (bias dropped, same reason).
    h = jnp.dot(h.astype(MATMUL_DTYPE), w2_ref[...],
                preferred_element_type=jnp.float32)
    h = _bn_relu(h, g2, be2, inv_n)
    # dropout2 (p=0.5) omitted — identity in eval / deterministic mode.

    # ad_layer3 + sigmoid: only one useful output column, so use a VPU multiply
    # by the w3 row + XLU lane reduce (f32) and store [B, 1] directly.
    y = jnp.sum(h * w3_row, axis=-1, keepdims=True) + b3_row[:, :1]
    out_ref[...] = jax.nn.sigmoid(y)


def gradient_discriminator(x, padded):
    """x: [B, in_feature] float32. `padded`: output of pad_params().
    Returns [B, 1] float32 (sigmoid probabilities)."""
    B, f = x.shape
    h_pad = padded["w2"].shape[0]

    args = (x, padded["w1"], padded["w2"], padded["vecs"])

    flops = 2 * B * (f * h_pad + h_pad * h_pad + h_pad) + 10 * B * h_pad
    transcendentals = B + 2 * h_pad                  # sigmoid + rsqrt rows
    bytes_accessed = sum(int(a.size) * a.dtype.itemsize for a in args) + B * 4

    vmem_spec = pl.BlockSpec(memory_space=pltpu.MemorySpace.VMEM)
    # TODO(synk): for large B (esp. v7x: 2 TCs, 64 MiB VMEM / 32 MiB scoped),
    # add a batch grid (dimension_semantics=('parallel',)) with a two-phase BN
    # (cross-tile sum/sumsq scratch) so batch statistics stay exact; tile ~2K
    # rows on v7x, 4-8K on v5e/v6e.
    return pl.pallas_call(
        _grad_disc_kernel,
        out_shape=jax.ShapeDtypeStruct((B, 1), jnp.float32),
        in_specs=[vmem_spec] * len(args),
        out_specs=vmem_spec,
        cost_estimate=pl.CostEstimate(
            flops=flops,
            transcendentals=transcendentals,
            bytes_accessed=bytes_accessed,
        ),
    )(*args)


def init_params(key, in_feature, hidden_size):
    """Mirrors init_weights(): Linear -> xavier_normal weight, zero bias;
    BatchNorm1d -> weight ~ N(1.0, 0.02), zero bias. Weights stored [in, out]."""
    ks = jax.random.split(key, 5)

    def xavier_normal(k, fan_in, fan_out):
        std = np.sqrt(2.0 / (fan_in + fan_out))
        return (std * jax.random.normal(k, (fan_in, fan_out))).astype(jnp.float32)

    return {
        "w1": xavier_normal(ks[0], in_feature, hidden_size),
        "b1": jnp.zeros((1, hidden_size), jnp.float32),
        "g1": (1.0 + 0.02 * jax.random.normal(ks[1], (1, hidden_size))).astype(jnp.float32),
        "be1": jnp.zeros((1, hidden_size), jnp.float32),
        "w2": xavier_normal(ks[2], hidden_size, hidden_size),
        "b2": jnp.zeros((1, hidden_size), jnp.float32),
        "g2": (1.0 + 0.02 * jax.random.normal(ks[3], (1, hidden_size))).astype(jnp.float32),
        "be2": jnp.zeros((1, hidden_size), jnp.float32),
        "w3": xavier_normal(ks[4], hidden_size, 1),
        "b3": jnp.zeros((1, 1), jnp.float32),
    }


def pad_params(p, in_feature, hidden_size):
    """One-time packing/padding of parameters to MXU/lane-friendly shapes.
    Zero padding keeps the padded columns exactly inert through the net
    (padded BN gamma is zero, so padded activations stay zero).
    b1/b2 are intentionally dropped (they cancel through batch-stats BN)."""
    h_pad = _round_up(hidden_size, LANE)
    dpad = h_pad - hidden_size

    def row(a):  # [1, hidden_size] -> [1, h_pad] f32
        return jnp.pad(a, ((0, 0), (0, dpad))).astype(jnp.float32)

    w3_row = jnp.pad(p["w3"].T, ((0, 0), (0, dpad))).astype(jnp.float32)
    b3_row = jnp.broadcast_to(p["b3"].astype(jnp.float32), (1, h_pad))
    vecs = jnp.concatenate(
        [row(p["g1"]), row(p["be1"]), row(p["g2"]), row(p["be2"]), w3_row, b3_row],
        axis=0)

    return {
        # w1 rows (K = in_feature) left unpadded: MXU handles K < 128.
        "w1": jnp.pad(p["w1"], ((0, 0), (0, dpad))).astype(MATMUL_DTYPE),
        "w2": jnp.pad(p["w2"], ((0, dpad), (0, dpad))).astype(MATMUL_DTYPE),
        "vecs": vecs,
    }


def reference_forward(x, p, matmul_dtype=jnp.float32, last_layer_f32=False):
    """Pure-JAX reference. matmul_dtype=jnp.float32 -> exact PyTorch f32
    semantics; matmul_dtype=MATMUL_DTYPE (+ last_layer_f32=True) matches the
    kernel's precision path (bf16 MXU for L1/L2, f32 VPU+reduce for L3)."""

    def dot(a, b, dt):
        return jnp.dot(a.astype(dt), b.astype(dt),
                       preferred_element_type=jnp.float32)

    def bn(h, g, be):
        m = h.mean(0, keepdims=True)
        v = ((h - m) ** 2).mean(0, keepdims=True)
        return (h - m) * jax.lax.rsqrt(v + BN_EPS) * g + be

    h = dot(x, p["w1"], matmul_dtype) + p["b1"]
    h = jnp.maximum(bn(h, p["g1"], p["be1"]), 0.0)
    h = dot(h, p["w2"], matmul_dtype) + p["b2"]
    h = jnp.maximum(bn(h, p["g2"], p["be2"]), 0.0)
    dt3 = jnp.float32 if last_layer_f32 else matmul_dtype
    y = dot(h, p["w3"], dt3) + p["b3"]
    return jax.nn.sigmoid(y)


if __name__ == "__main__":
    in_feature, hidden_size, batch = 32, 64, 8

    key = jax.random.PRNGKey(0)
    kx, kp = jax.random.split(key)
    x = jax.random.normal(kx, (batch, in_feature), dtype=jnp.float32)
    params = init_params(kp, in_feature, hidden_size)
    padded = pad_params(params, in_feature, hidden_size)   # one-time setup cost

    y = gradient_discriminator(x, padded)
    y = jax.block_until_ready(y)
    assert y.shape == (batch, 1) and y.dtype == jnp.float32

    # Tight check: kernel vs. a reference using the same precision path.
    y_ref_mxu = reference_forward(x, params, MATMUL_DTYPE, last_layer_f32=True)
    np.testing.assert_allclose(np.asarray(y), np.asarray(y_ref_mxu),
                               rtol=1e-5, atol=1e-4)

    # Loose check: deviation from exact PyTorch-f32 semantics stays small
    # (only source of difference is bf16 MXU operands in L1/L2).
    y_ref_f32 = reference_forward(x, params, jnp.float32)
    np.testing.assert_allclose(np.asarray(y), np.asarray(y_ref_f32),
                               rtol=0.0, atol=5e-2)

    print("KERNEL_OK")
</pallas_src>

<mosaic_0001>
module attributes {stable_mosaic.version = 11 : i64} {
  func.func @_grad_disc_kernel(%arg0: memref<8x32xf32, #tpu.memory_space<vmem>>, %arg1: memref<32x128xbf16, #tpu.memory_space<vmem>>, %arg2: memref<128x128xbf16, #tpu.memory_space<vmem>>, %arg3: memref<6x128xf32, #tpu.memory_space<vmem>>, %arg4: memref<8x1xf32, #tpu.memory_space<vmem>>) attributes {dimension_semantics = [], scalar_prefetch = 0 : i64, scratch_operands = 0 : i64, tpu.core_type = #tpu.core_type<tc>} {
    %c0 = arith.constant 0 : index
    %c0_0 = arith.constant 0 : index
    %0 = vector.load %arg3[%c0, %c0_0] : memref<6x128xf32, #tpu.memory_space<vmem>>, vector<1x128xf32>
    %c1 = arith.constant 1 : index
    %c0_1 = arith.constant 0 : index
    %1 = vector.load %arg3[%c1, %c0_1] : memref<6x128xf32, #tpu.memory_space<vmem>>, vector<1x128xf32>
    %c2 = arith.constant 2 : index
    %c0_2 = arith.constant 0 : index
    %2 = vector.load %arg3[%c2, %c0_2] : memref<6x128xf32, #tpu.memory_space<vmem>>, vector<1x128xf32>
    %c3 = arith.constant 3 : index
    %c0_3 = arith.constant 0 : index
    %3 = vector.load %arg3[%c3, %c0_3] : memref<6x128xf32, #tpu.memory_space<vmem>>, vector<1x128xf32>
    %c4 = arith.constant 4 : index
    %c0_4 = arith.constant 0 : index
    %4 = vector.load %arg3[%c4, %c0_4] : memref<6x128xf32, #tpu.memory_space<vmem>>, vector<1x128xf32>
    %c5 = arith.constant 5 : index
    %c0_5 = arith.constant 0 : index
    %5 = vector.load %arg3[%c5, %c0_5] : memref<6x128xf32, #tpu.memory_space<vmem>>, vector<1x128xf32>
    %c0_6 = arith.constant 0 : index
    %c0_7 = arith.constant 0 : index
    %6 = vector.load %arg0[%c0_6, %c0_7] : memref<8x32xf32, #tpu.memory_space<vmem>>, vector<8x32xf32>
    %7 = arith.truncf %6 : vector<8x32xf32> to vector<8x32xbf16>
    %c0_8 = arith.constant 0 : index
    %c0_9 = arith.constant 0 : index
    %8 = vector.load %arg1[%c0_8, %c0_9] : memref<32x128xbf16, #tpu.memory_space<vmem>>, vector<32x128xbf16>
    %cst = arith.constant dense<0.000000e+00> : vector<8x128xf32>
    %9 = tpu.matmul %7, %8, %cst {dimension_numbers = #tpu.dot_dimension_numbers<[1], [0], [0], [1], [0, 0, 1, 1], [], []>} : vector<8x32xbf16>, vector<32x128xbf16>, vector<8x128xf32> -> vector<8x128xf32>
    %cst_10 = arith.constant dense<0.000000e+00> : vector<128xf32>
    %10 = vector.multi_reduction <add>, %9, %cst_10 [0] : vector<8x128xf32> to vector<128xf32>
    %11 = vector.shape_cast %10 : vector<128xf32> to vector<1x128xf32>
    %12 = arith.mulf %9, %9 : vector<8x128xf32>
    %cst_11 = arith.constant dense<0.000000e+00> : vector<128xf32>
    %13 = vector.multi_reduction <add>, %12, %cst_11 [0] : vector<8x128xf32> to vector<128xf32>
    %14 = vector.shape_cast %13 : vector<128xf32> to vector<1x128xf32>
    %cst_12 = arith.constant 1.250000e-01 : f32
    %15 = vector.broadcast %cst_12 : f32 to vector<1x128xf32>
    %16 = arith.mulf %11, %15 : vector<1x128xf32>
    %cst_13 = arith.constant 1.250000e-01 : f32
    %17 = vector.broadcast %cst_13 : f32 to vector<1x128xf32>
    %18 = arith.mulf %14, %17 : vector<1x128xf32>
    %19 = arith.mulf %16, %16 : vector<1x128xf32>
    %20 = arith.subf %18, %19 : vector<1x128xf32>
    %cst_14 = arith.constant 0.000000e+00 : f32
    %21 = vector.broadcast %cst_14 : f32 to vector<1x128xf32>
    %22 = arith.maximumf %20, %21 : vector<1x128xf32>
    %cst_15 = arith.constant 9.99999974E-6 : f32
    %23 = vector.broadcast %cst_15 : f32 to vector<1x128xf32>
    %24 = arith.addf %22, %23 : vector<1x128xf32>
    %25 = math.rsqrt %24 : vector<1x128xf32>
    %26 = arith.mulf %25, %0 : vector<1x128xf32>
    %27 = arith.mulf %16, %26 : vector<1x128xf32>
    %28 = arith.subf %1, %27 : vector<1x128xf32>
    %29 = vector.broadcast %26 : vector<1x128xf32> to vector<8x128xf32>
    %30 = arith.mulf %9, %29 : vector<8x128xf32>
    %31 = vector.broadcast %28 : vector<1x128xf32> to vector<8x128xf32>
    %32 = arith.addf %30, %31 : vector<8x128xf32>
    %cst_16 = arith.constant 0.000000e+00 : f32
    %33 = vector.broadcast %cst_16 : f32 to vector<8x128xf32>
    %34 = arith.maximumf %32, %33 : vector<8x128xf32>
    %35 = arith.truncf %34 : vector<8x128xf32> to vector<8x128xbf16>
    %c0_17 = arith.constant 0 : index
    %c0_18 = arith.constant 0 : index
    %36 = vector.load %arg2[%c0_17, %c0_18] : memref<128x128xbf16, #tpu.memory_space<vmem>>, vector<128x128xbf16>
    %cst_19 = arith.constant dense<0.000000e+00> : vector<8x128xf32>
    %37 = tpu.matmul %35, %36, %cst_19 {dimension_numbers = #tpu.dot_dimension_numbers<[1], [0], [0], [1], [0, 0, 1, 1], [], []>} : vector<8x128xbf16>, vector<128x128xbf16>, vector<8x128xf32> -> vector<8x128xf32>
    %cst_20 = arith.constant dense<0.000000e+00> : vector<128xf32>
    %38 = vector.multi_reduction <add>, %37, %cst_20 [0] : vector<8x128xf32> to vector<128xf32>
    %39 = vector.shape_cast %38 : vector<128xf32> to vector<1x128xf32>
    %40 = arith.mulf %37, %37 : vector<8x128xf32>
    %cst_21 = arith.constant dense<0.000000e+00> : vector<128xf32>
    %41 = vector.multi_reduction <add>, %40, %cst_21 [0] : vector<8x128xf32> to vector<128xf32>
    %42 = vector.shape_cast %41 : vector<128xf32> to vector<1x128xf32>
    %cst_22 = arith.constant 1.250000e-01 : f32
    %43 = vector.broadcast %cst_22 : f32 to vector<1x128xf32>
    %44 = arith.mulf %39, %43 : vector<1x128xf32>
    %cst_23 = arith.constant 1.250000e-01 : f32
    %45 = vector.broadcast %cst_23 : f32 to vector<1x128xf32>
    %46 = arith.mulf %42, %45 : vector<1x128xf32>
    %47 = arith.mulf %44, %44 : vector<1x128xf32>
    %48 = arith.subf %46, %47 : vector<1x128xf32>
    %cst_24 = arith.constant 0.000000e+00 : f32
    %49 = vector.broadcast %cst_24 : f32 to vector<1x128xf32>
    %50 = arith.maximumf %48, %49 : vector<1x128xf32>
    %cst_25 = arith.constant 9.99999974E-6 : f32
    %51 = vector.broadcast %cst_25 : f32 to vector<1x128xf32>
    %52 = arith.addf %50, %51 : vector<1x128xf32>
    %53 = math.rsqrt %52 : vector<1x128xf32>
    %54 = arith.mulf %53, %2 : vector<1x128xf32>
    %55 = arith.mulf %44, %54 : vector<1x128xf32>
    %56 = arith.subf %3, %55 : vector<1x128xf32>
    %57 = vector.broadcast %54 : vector<1x128xf32> to vector<8x128xf32>
    %58 = arith.mulf %37, %57 : vector<8x128xf32>
    %59 = vector.broadcast %56 : vector<1x128xf32> to vector<8x128xf32>
    %60 = arith.addf %58, %59 : vector<8x128xf32>
    %cst_26 = arith.constant 0.000000e+00 : f32
    %61 = vector.broadcast %cst_26 : f32 to vector<8x128xf32>
    %62 = arith.maximumf %60, %61 : vector<8x128xf32>
    %63 = vector.broadcast %4 : vector<1x128xf32> to vector<8x128xf32>
    %64 = arith.mulf %62, %63 : vector<8x128xf32>
    %cst_27 = arith.constant dense<0.000000e+00> : vector<8xf32>
    %65 = vector.multi_reduction <add>, %64, %cst_27 [1] : vector<8x128xf32> to vector<8xf32>
    %66 = vector.shape_cast %65 : vector<8xf32> to vector<8x1xf32>
    %67 = vector.extract_strided_slice %5 {offsets = [0, 0], sizes = [1, 1], strides = [1, 1]} : vector<1x128xf32> to vector<1x1xf32>
    %68 = vector.broadcast %67 : vector<1x1xf32> to vector<8x1xf32>
    %69 = arith.addf %66, %68 : vector<8x1xf32>
    %70 = arith.negf %69 : vector<8x1xf32>
    %71 = math.exp %70 : vector<8x1xf32>
    %cst_28 = arith.constant 1.000000e+00 : f32
    %72 = vector.broadcast %cst_28 : f32 to vector<8x1xf32>
    %73 = arith.addf %72, %71 : vector<8x1xf32>
    %74 = arith.divf %72, %73 : vector<8x1xf32>
    %c0_29 = arith.constant 0 : index
    %c0_30 = arith.constant 0 : index
    %75 = vector.load %arg4[%c0_29, %c0_30] : memref<8x1xf32, #tpu.memory_space<vmem>>, vector<8x1xf32>
    tpu.vector_store %arg4[%c0_29, %c0_30], %74 {strides = array<i32>} : memref<8x1xf32, #tpu.memory_space<vmem>>, vector<8x1xf32>,
    return
  }
}

</mosaic_0001>

<bundles_post_ra>
// kernel: tpu_custom_call.1
= control target key start
LH: loop header
LB: loop body
LE: loop exit
PB: predicated region body
PF: predicated region fallthrough
CT: control target
= control target key end

     0   :  { %9 = vsyncpa [#allocation3], 0  ;;  %s520_s0 = inlined_call_operand.hbm [shape: f32[8,32], index: 0, kind: input, shape index: {}]   ;;  %s521_s1 = inlined_call_operand.hbm [shape: bf16[32,128], index: 1, kind: input, shape index: {}]   ;;  %s522_s2 = inlined_call_operand.hbm [shape: bf16[128,128], index: 2, kind: input, shape index: {}]   ;;  %s523_s3 = inlined_call_operand.hbm [shape: f32[6,128], index: 3, kind: input, shape index: {}]   ;;  %s524_s4 = inlined_call_operand.vmem [shape: f32[8,1], index: 4, kind: output, shape index: {}]  }
   0x1   :  { %10 = vsyncpa [#allocation5], 0  ;;  %s27_s17 = sshll.u32 %s521_s1, 4  ;;  %s28_s17 = int_to_ptr.hbm [resolvable:$true] %s27_s17 }
   0x2   :  { %11 = vsyncpa [#allocation8], 0  ;;  %s474_s18 = smov [#allocation4]   ;;  %s17_s22 = sshll.u32 %s520_s0, 4  ;;  %s18_s22 = int_to_ptr.hbm [resolvable:$true] %s17_s22 }
   0x3   :  { %s29_s19 = sshll.u32 %s474_s18, 4  ;;  %s475_s23 = smov 64   ;;  %s30_s19 = int_to_ptr.vmem [resolvable:$true] %s29_s19 }
   0x4   :  { %s476_s24 = smov 4   ;;  %s477_s25 = smov [#allocation2]  }
   0x5   :  { %35 = dma.hbm_to_vmem [thread:$0]  %s28_s17, 256, %s30_s19, [#allocation5], %s475_s23, %s475_s23, %s476_s24  }
   0x6   :  { %s19_s26 = sshll.u32 %s477_s25, 4  ;;  %s40_s29 = sshll.u32 %s522_s2, 4  ;;  %s20_s26 = int_to_ptr.vmem [resolvable:$true] %s19_s26  ;;  %s41_s29 = int_to_ptr.hbm [resolvable:$true] %s40_s29 }
   0x7   :  { %22 = dma.hbm_to_vmem [thread:$0]  %s18_s22, 128, %s20_s26, [#allocation3]  }
   0x8   :  { %s54_s5 = sshll.u32 %s523_s3, 4  ;;  %s478_s6 = smov [#allocation6]   ;;  %s55_s5 = int_to_ptr.hbm [resolvable:$true] %s54_s5 }
   0x9   :  { %s42_s7 = sshll.u32 %s478_s6, 4  ;;  %s479_s0 = smov [#allocation7]   ;;  %s43_s7 = int_to_ptr.vmem [resolvable:$true] %s42_s7 }
   0xa   :  { %48 = dma.hbm_to_vmem [thread:$0]  %s41_s29, 1024, %s43_s7, [#allocation5], %s475_s23, %s475_s23, %s476_s24  }
   0xb   :  { %s56_s8 = sshll.u32 %s479_s0, 4  ;;  %s57_s8 = int_to_ptr.vmem [resolvable:$true] %s56_s8 }
   0xc   :  { %59 = dma.hbm_to_vmem [thread:$0]  %s55_s5, 128, %s57_s8, [#allocation8]  }
   0xd   :  { %468 = dma.done.wait [#allocation3], 128  }
   0xe   :  { %469 = vsyncadd [#allocation3], 4294967168 }
   0xf   :  { %470 = dma.done.wait [#allocation5], 1280  }
  0x10   :  { %471 = vsyncadd [#allocation5], 4294966016 }
  0x11   :  { %472 = dma.done.wait [#allocation8], 128  }
  0x12   :  { %473 = vsyncadd [#allocation8], 4294967168  ;;  %v347_v0 = vld [vmem:[#allocation4 + $0x8] sm:$0xff]  ;;  %v346_v1 = vld [vmem:[#allocation4] sm:$0xff]  ;;  %vm101_vm0 = vcmask 261120   ;;  %vm295_vm10 = vcmask 7168  }
  0x13   :  { %111 = vmatpush.bf16.msra.mxu0 %v347_v0  ;;  %v83_v2 = vld [vmem:[#allocation2] sm:$0xff]  ;;  %v355_v4 = vld [vmem:[#allocation6 + $0x38] sm:$0xff]  ;;  %v354_v5 = vld [vmem:[#allocation6 + $0x30] sm:$0xff] }
  0x14   :  { %v84_v3 = vpack.c.bf16 %v83_v2, %v83_v2  ;;  %220 = vmatpush.bf16.msra.mxu1 %v355_v4  ;;  %v353_v6 = vld [vmem:[#allocation6 + $0x28] sm:$0xff]  ;;  %v352_v7 = vld [vmem:[#allocation6 + $0x20] sm:$0xff]  ;;  %v351_v8 = vld [vmem:[#allocation6 + $0x18] sm:$0xff] }
  0x15   :  { %v350_v12 = vld [vmem:[#allocation6 + $0x10] sm:$0xff]  ;;  %v349_v17 = vld [vmem:[#allocation6 + $0x8] sm:$0xff]  ;;  %v348_v23 = vld [vmem:[#allocation6] sm:$0xff] }
  0x16   :  { %v77_v38 = vld [vmem:[#allocation7] sm:$0x1]  ;;  %v78_v42 = vld [vmem:[#allocation7 + $0x1] sm:$0x1] }
  0x17   :  { %112 = vmatpush.bf16.msra.mxu0 %v346_v1 }
  0x18   :  { %221 = vmatpush.bf16.msra.mxu1 %v354_v5 }
  0x1a   :  { %312 = vmatmul.msk.bf16.vlgmr.msra.gmra.mxu0 %vm101_vm0, %v84_v3 }
  0x1c   :  { %222 = vmatpush.bf16.msra.mxu1 %v353_v6 }
  0x20   :  { %223 = vmatpush.bf16.msra.mxu1 %v352_v7 }
  0x24   :  { %224 = vmatpush.bf16.msra.mxu1 %v351_v8 }
  0x28   :  { %225 = vmatpush.bf16.msra.mxu1 %v350_v12 }
  0x2c   :  { %226 = vmatpush.bf16.msra.mxu1 %v349_v17  ;;  %v80_v17 = vld [vmem:[#allocation7 + $0x3] sm:$0x1] }
  0x30   :  { %227 = vmatpush.bf16.msra.mxu1 %v348_v23 }
  0x97   :  { %v114_v9 = vpop.f32.mrf.mxu0 }
  0x98   :  { %v118_v10 = vrot.slane %v114_v9, 4  ;;  %v124_v11 = vmul.f32 %v114_v9, %v114_v9 }
  0x9a   :  { %v119_v13 = vadd.f32 %v118_v10, %v114_v9  ;;  %v125_v14 = vrot.slane %v124_v11, 4 }
  0x9c   :  { %v120_v15 = vrot.slane %v119_v13, 2  ;;  %v126_v16 = vadd.f32 %v125_v14, %v124_v11 }
  0x9e   :  { %v121_v18 = vadd.f32 %v120_v15, %v119_v13  ;;  %v127_v19 = vrot.slane %v126_v16, 2  ;;  %v79_v13 = vld [vmem:[#allocation7 + $0x2] sm:$0x1] }
  0x9f   :  { %v116_v20 = vpop.f32.mrf.mxu0 }
  0xa0   :  { %v122_v21 = vrot.slane %v121_v18, 1  ;;  %v128_v22 = vadd.f32 %v127_v19, %v126_v16 }
  0xa2   :  { %v129_v24 = vrot.slane %v128_v22, 1  ;;  %v123_v25 = vadd.f32 %v122_v21, %v121_v18 }
  0xa4   :  { %v130_v26 = vadd.f32 %v129_v24, %v128_v22  ;;  %v131_v27 = vmul.f32 0.125, %v123_v25  ;;  %v362_v24 = vld [vmem:[#allocation7 + $0x4] ss:$0 sm:$0xff] }
  0xa6   :  { %v132_v28 = vmul.f32 0.125, %v130_v26  ;;  %v133_v29 = vmul.f32 %v131_v27, %v131_v27 }
  0xa8   :  { %v134_v30 = vsub.f32 %v132_v28, %v133_v29 }
  0xaa   :  { %v135_v31 = vmax.f32 %v134_v30, 0.0 }
  0xac   :  { %v136_v32 = vadd.f32 1e-05, %v135_v31 }
  0xae   :  { %364 = vrsqrt.f32 %v136_v32  ;;  %vm143_vm2 = vweird.f32 %v136_v32 }
  0xb4   :  { %v365_v33 = vpop.eup %364 }
  0xb5   :  { %v138_v34 = vmul.f32 %v365_v33, %v136_v32  ;;  %vm144_vm1 = vweird.f32 %v365_v33 }
  0xb6   :  { %vm145_vm3 = vmor %vm143_vm2, %vm144_vm1 }
  0xb7   :  { %v139_v35 = vmul.f32 %v365_v33, %v138_v34 }
  0xb9   :  { %v140_v36 = vmul.f32 0.5, %v139_v35 }
  0xbb   :  { %v141_v37 = vsub.f32 1.5, %v140_v36 }
  0xbd   :  { %v142_v39 = vmul.f32 %v365_v33, %v141_v37 }
  0xbf   :  { %v146_v40 = vsel %vm145_vm3, %v365_v33, %v142_v39 }
  0xc0   :  { %v147_v41 = vmul.f32 %v146_v40, %v77_v38 }
  0xc2   :  { %v148_v43 = vmul.f32 %v147_v41, %v131_v27  ;;  %v150_v44 = vperm.slane %v147_v41, 0  ;;  %v363_v27 = vld [vmem:[#allocation7 + $0x5] ss:$0 sm:$0xff] }
  0xc4   :  { %v149_v45 = vsub.f32 %v78_v42, %v148_v43  ;;  %v151_v46 = vmul.f32 %v150_v44, %v114_v9 }
  0xc6   :  { %v152_v47 = vperm.slane %v149_v45, 0 }
  0xc8   :  { %v153_v48 = vadd.f32 %v152_v47, %v151_v46 }
  0xca   :  { %v154_v49 = vmax.f32 %v153_v48, 0.0 }
  0xcc   :  { %v155_v50 = vpack.c.bf16 %v154_v49, %v154_v49 }
  0xce   :  { %228 = vmatmul.bf16.vlgmr.msra.gmra.mxu1 %v155_v50 }
 0x14b   :  { %v229_v51 = vpop.f32.mrf.mxu1 }
 0x14c   :  { %v233_v52 = vrot.slane %v229_v51, 4  ;;  %v239_v53 = vmul.f32 %v229_v51, %v229_v51 }
 0x14e   :  { %v234_v54 = vadd.f32 %v233_v52, %v229_v51  ;;  %v240_v55 = vrot.slane %v239_v53, 4 }
 0x150   :  { %v235_v56 = vrot.slane %v234_v54, 2  ;;  %v241_v57 = vadd.f32 %v240_v55, %v239_v53 }
 0x152   :  { %v236_v58 = vadd.f32 %v235_v56, %v234_v54  ;;  %v242_v59 = vrot.slane %v241_v57, 2 }
 0x153   :  { %v231_v60 = vpop.f32.mrf.mxu1 }
 0x154   :  { %v237_v61 = vrot.slane %v236_v58, 1  ;;  %v243_v62 = vadd.f32 %v242_v59, %v241_v57 }
 0x156   :  { %v244_v63 = vrot.slane %v243_v62, 1  ;;  %v238_v0 = vadd.f32 %v237_v61, %v236_v58 }
 0x158   :  { %v245_v1 = vadd.f32 %v244_v63, %v243_v62  ;;  %v246_v2 = vmul.f32 0.125, %v238_v0 }
 0x15a   :  { %v247_v3 = vmul.f32 0.125, %v245_v1  ;;  %v248_v4 = vmul.f32 %v246_v2, %v246_v2 }
 0x15c   :  { %v249_v5 = vsub.f32 %v247_v3, %v248_v4 }
 0x15e   :  { %v250_v6 = vmax.f32 %v249_v5, 0.0 }
 0x160   :  { %v251_v7 = vadd.f32 1e-05, %v250_v6 }
 0x162   :  { %366 = vrsqrt.f32 %v251_v7  ;;  %vm258_vm5 = vweird.f32 %v251_v7 }
 0x168   :  { %v367_v8 = vpop.eup %366 }
 0x169   :  { %v253_v9 = vmul.f32 %v367_v8, %v251_v7  ;;  %vm259_vm4 = vweird.f32 %v367_v8 }
 0x16a   :  { %vm260_vm6 = vmor %vm258_vm5, %vm259_vm4 }
 0x16b   :  { %v254_v10 = vmul.f32 %v367_v8, %v253_v9 }
 0x16d   :  { %v255_v11 = vmul.f32 0.5, %v254_v10 }
 0x16f   :  { %v256_v12 = vsub.f32 1.5, %v255_v11 }
 0x171   :  { %v257_v14 = vmul.f32 %v367_v8, %v256_v12 }
 0x173   :  { %v261_v15 = vsel %vm260_vm6, %v367_v8, %v257_v14 }
 0x174   :  { %v262_v16 = vmul.f32 %v261_v15, %v79_v13 }
 0x176   :  { %v263_v18 = vmul.f32 %v262_v16, %v246_v2  ;;  %v265_v19 = vperm.slane %v262_v16, 0 }
 0x178   :  { %v264_v20 = vsub.f32 %v80_v17, %v263_v18  ;;  %v266_v21 = vmul.f32 %v265_v19, %v229_v51 }
 0x17a   :  { %v267_v22 = vperm.slane %v264_v20, 0 }
 0x17c   :  { %v268_v23 = vadd.f32 %v267_v22, %v266_v21 }
 0x17e   :  { %v269_v25 = vmax.f32 %v268_v23, 0.0 }
 0x180   :  { %v271_v26 = vmul.f32 %v362_v24, %v269_v25 }
 0x182   :  { %272 = vadd.xlane.f32.xlu0 %v271_v26 }
 0x1f5   :  { %v273_v28 = vpop.xlane.xlu0 %272 }
 0x1f6   :  { %v275_v29 = vadd.f32 %v363_v27, %v273_v28 }
 0x1f8   :  { %v345_v30 = vmul.f32 -1.442695, %v275_v29 }
 0x1fa   :  { %368 = vpow2.f32 %v345_v30 }
 0x200   :  { %v369_v31 = vpop.eup %368 }
 0x201   :  { %v279_v32 = vadd.f32 1.0, %v369_v31 }
 0x203   :  { %370 = vrcp.f32 %v279_v32  ;;  %v291_v36 = vand.u32 2147483648, %v279_v32  ;;  %v289_v38 = vand.u32 2147483647, %v279_v32  ;;  %vm285_vm8 = vweird.f32 %v279_v32 }
 0x205   :  { %v292_v40 = vor.u32 1.1754944e-38, %v291_v36  ;;  %vm290_vm11 = vcmp.eq.f32.partialorder %v289_v38, 8.507059e+37 }
 0x209   :  { %v371_v33 = vpop.eup %370 }
 0x20a   :  { %v281_v34 = vmul.f32 %v371_v33, %v279_v32  ;;  %vm286_vm7 = vweird.f32 %v371_v33 }
 0x20b   :  { %vm287_vm9 = vmor %vm285_vm8, %vm286_vm7 }
 0x20c   :  { %v282_v35 = vsub.f32 1.0, %v281_v34 }
 0x20e   :  { %v283_v37 = vmul.f32 %v371_v33, %v282_v35 }
 0x210   :  { %v284_v39 = vadd.f32 %v371_v33, %v283_v37 }
 0x212   :  { %v288_v41 = vsel %vm287_vm9, %v371_v33, %v284_v39 }
 0x213   :  { %v293_v42 = vsel %vm290_vm11, %v292_v40, %v288_v41 }
 0x214   :  { %296 = vst.msk [vmem:[%s524_s4] sm:$0xff] %vm295_vm10, %v293_v42 }
 0x215   :  { %301 = vsyncpa [#allocation3], 1 }
 0x216   :  { %302 = vsyncpa [#allocation5], 1 }
 0x217   :  { %303 = vsyncpa [#allocation8], 1 }

</bundles_post_ra>
